<compile_context>
chip_gen: v7x
topology: tpu7x:2x2x1
jax: 0.10.0
libtpu: 0.0.40
codegen_flags: <defaults>
</compile_context>

<pallas_src>
import jax
import jax.numpy as jnp
from jax import lax
from jax.experimental import pallas as pl
from jax.experimental.pallas import tpu as pltpu


TILE_I = 128  # rows (i index) per grid step


def _surv_ple_kernel(n_ref, row_ref, col_ref, out_ref, acc_ref):
    """One i-tile of  -sum_i E_i * (theta_i - log(sum_j exp(theta_j)*[T_j >= T_i]))."""
    i_blk = pl.program_id(0)
    n = n_ref[0]                                   # runtime batch size (int32)

    tile_i = col_ref.shape[0]
    N = row_ref.shape[1]

    @pl.when(i_blk == 0)
    def _init():
        acc_ref[...] = jnp.zeros_like(acc_ref)

    y_row = row_ref[0:1, :]                        # (1, N)      j on lanes
    th_row = row_ref[1:2, :]                       # (1, N)
    y_col = col_ref[:, 0:1]                        # (tile_i, 1) i on sublanes
    th_col = col_ref[:, 1:2]                       # (tile_i, 1)

    # Validity masks for the zero padding.
    j_idx = lax.broadcasted_iota(jnp.int32, (1, N), 1)
    i_idx = i_blk * tile_i + lax.broadcasted_iota(jnp.int32, (tile_i, 1), 0)
    valid_j = j_idx < n
    valid_i = i_idx < n

    T_j = jnp.abs(y_row)                           # (1, N)      observed times
    T_i = jnp.abs(y_col)                           # (tile_i, 1)
    E_i = jnp.logical_and(y_col > 0.0, valid_i)    # (tile_i, 1) event indicator

    # Log-sum-exp shift (mathematically a no-op, avoids exp overflow).
    neg_big = jnp.float32(-3.0e38)
    m = jnp.max(jnp.where(valid_j, th_row, neg_big), axis=1, keepdims=True)  # (1,1)
    exp_th = jnp.exp(th_row - m)                   # (1, N)

    # Fused risk-set mask + exp: a single select feeds the lane reduce; the
    # standalone 0/1 R matrix and the extra (tile_i, N) multiply are gone.
    in_risk_set = jnp.logical_and(T_j >= T_i, valid_j)                 # (tile_i, N)
    risk = jnp.sum(jnp.where(in_risk_set, exp_th, jnp.float32(0.0)),
                   axis=1, keepdims=True)                              # (tile_i, 1)

    term = jnp.where(E_i, th_col - (jnp.log(risk) + m),
                     jnp.float32(0.0))                                 # (tile_i, 1)
    acc_ref[...] += jnp.sum(term, axis=0, keepdims=True)               # (1, 1)

    @pl.when(i_blk == pl.num_programs(0) - 1)
    def _finalize():
        inv_n = jnp.float32(1.0) / n.astype(jnp.float32)
        # NOTE: scalar emitted as a (1,1) VMEM block (kept over an SMEM scalar
        # output for lowering robustness of the vector->scalar move).
        out_ref[...] = -acc_ref[...] * inv_n


def surv_ple_loss(y, y_hat, *, tile_i=TILE_I):
    """Pallas implementation of SurvPLE.forward(y, y_hat) -> scalar loss."""
    y = y.astype(jnp.float32).reshape(-1)
    theta = y_hat.astype(jnp.float32).reshape(-1)
    n = y.shape[0]

    num_tiles = max(1, pl.cdiv(n, tile_i))
    N = num_tiles * tile_i
    pad = N - n
    y_p = jnp.pad(y, (0, pad))
    th_p = jnp.pad(theta, (0, pad))

    row_slab = jnp.stack([y_p, th_p], axis=0)      # (2, N): j on lanes
    col_slab = jnp.stack([y_p, th_p], axis=1)      # (N, 2): i on sublanes
    n_arr = jnp.array([n], dtype=jnp.int32)        # runtime batch size

    out = pl.pallas_call(
        _surv_ple_kernel,
        out_shape=jax.ShapeDtypeStruct((1, 1), jnp.float32),
        grid_spec=pltpu.PrefetchScalarGridSpec(
            num_scalar_prefetch=1,
            grid=(num_tiles,),
            in_specs=[
                pl.BlockSpec((2, N), lambda i, n_ref: (0, 0)),       # resident slab
                pl.BlockSpec((tile_i, 2), lambda i, n_ref: (i, 0)),  # per-tile rows
            ],
            out_specs=pl.BlockSpec((1, 1), lambda i, n_ref: (0, 0)),
            scratch_shapes=[pltpu.VMEM((1, 1), jnp.float32)],
        ),
        compiler_params=pltpu.CompilerParams(
            # i-axis revisits the scalar accumulator/output -> "arbitrary".
            dimension_semantics=("arbitrary",)),
    )(n_arr, row_slab, col_slab)

    return out[0, 0]


def _surv_ple_ref(y, y_hat):
    """Pure-JAX reference, matching the PyTorch forward exactly."""
    y = y.astype(jnp.float32)
    theta = y_hat.astype(jnp.float32).reshape(-1)
    T = jnp.abs(y)
    E = (y > 0).astype(jnp.float32)
    R = (T[None, :] >= T[:, None]).astype(jnp.float32)
    risk = jnp.sum(jnp.exp(theta)[None, :] * R, axis=1)
    return -jnp.mean((theta - jnp.log(risk)) * E)


def _make_inputs(key, n):
    k_t, k_e, k_h = jax.random.split(key, 3)
    # y: |y| = observed time, sign = censor status (negative => censored).
    times = jax.random.uniform(k_t, (n,), minval=0.5, maxval=5.0,
                               dtype=jnp.float32)
    events = jax.random.bernoulli(k_e, 0.6, (n,))
    y = jnp.where(events, times, -times)
    # y_hat: model risk predictions, shape (n, 1).
    y_hat = jax.random.normal(k_h, (n, 1), dtype=jnp.float32)
    return y, y_hat


if __name__ == "__main__":
    key = jax.random.PRNGKey(0)
    k_small, k_big = jax.random.split(key)

    # Small batch (single i-tile).
    y, y_hat = _make_inputs(k_small, 8)
    loss = surv_ple_loss(y, y_hat)
    jax.block_until_ready(loss)
    ref = _surv_ple_ref(y, y_hat)
    assert jnp.allclose(loss, ref, rtol=2e-5, atol=1e-5), (loss, ref)

    # Larger batch exercising the multi-tile accumulation path.
    y2, y_hat2 = _make_inputs(k_big, 200)
    loss2 = surv_ple_loss(y2, y_hat2)
    jax.block_until_ready(loss2)
    ref2 = _surv_ple_ref(y2, y_hat2)
    assert jnp.allclose(loss2, ref2, rtol=2e-5, atol=1e-5), (loss2, ref2)

    print("KERNEL_OK")
</pallas_src>

<mosaic_0001>
module attributes {stable_mosaic.version = 11 : i64} {
  func.func @_surv_ple_kernel(%arg0: i32, %arg1: memref<1xi32, #tpu.memory_space<smem>>, %arg2: memref<2x128xf32, #tpu.memory_space<vmem>>, %arg3: memref<128x2xf32, #tpu.memory_space<vmem>>, %arg4: memref<1x1xf32, #tpu.memory_space<vmem>>, %arg5: memref<1x1xf32, #tpu.memory_space<vmem>>) attributes {dimension_semantics = [#tpu.dimension_semantics<arbitrary>], iteration_bounds = array<i64: 1>, scalar_prefetch = 1 : i64, scratch_operands = 1 : i64, tpu.core_type = #tpu.core_type<tc>, window_params = [{pipeline_mode = #tpu.pipeline_mode<synchronous>, transform_indices = @transform_0, window_bounds = array<i64: 2, 128>}, {transform_indices = @transform_1, window_bounds = array<i64: 128, 2>}, {pipeline_mode = #tpu.pipeline_mode<synchronous>, transform_indices = @transform_2, window_bounds = array<i64: 1, 1>}]} {
    %c0 = arith.constant 0 : index
    %0 = memref.load %arg1[%c0] : memref<1xi32, #tpu.memory_space<smem>>
    %c0_i32 = arith.constant 0 : i32
    %1 = arith.cmpi eq, %arg0, %c0_i32 : i32
    %2 = arith.extui %1 : i1 to i32
    %c0_i32_0 = arith.constant 0 : i32
    %3 = arith.cmpi ne, %2, %c0_i32_0 : i32
    scf.if %3 {
      %cst_20 = arith.constant 0.000000e+00 : f32
      %54 = vector.broadcast %cst_20 : f32 to vector<1x1xf32>
      %c0_21 = arith.constant 0 : index
      %c0_22 = arith.constant 0 : index
      %55 = vector.load %arg5[%c0_21, %c0_22] : memref<1x1xf32, #tpu.memory_space<vmem>>, vector<1x1xf32>
      tpu.vector_store %arg5[%c0_21, %c0_22], %54 {strides = array<i32>} : memref<1x1xf32, #tpu.memory_space<vmem>>, vector<1x1xf32>,
    } else {
    }
    %c0_1 = arith.constant 0 : index
    %c0_2 = arith.constant 0 : index
    %4 = vector.load %arg2[%c0_1, %c0_2] : memref<2x128xf32, #tpu.memory_space<vmem>>, vector<1x128xf32>
    %c1 = arith.constant 1 : index
    %c0_3 = arith.constant 0 : index
    %5 = vector.load %arg2[%c1, %c0_3] : memref<2x128xf32, #tpu.memory_space<vmem>>, vector<1x128xf32>
    %c0_4 = arith.constant 0 : index
    %c0_5 = arith.constant 0 : index
    %6 = vector.load %arg3[%c0_4, %c0_5] : memref<128x2xf32, #tpu.memory_space<vmem>>, vector<128x1xf32>
    %c0_6 = arith.constant 0 : index
    %c1_7 = arith.constant 1 : index
    %7 = vector.load %arg3[%c0_6, %c1_7] : memref<128x2xf32, #tpu.memory_space<vmem>>, vector<128x1xf32>
    %8 = tpu.iota {dimensions = array<i32: 1>} : vector<1x128xi32>
    %c128_i32 = arith.constant 128 : i32
    %9 = arith.muli %arg0, %c128_i32 : i32
    %10 = tpu.iota {dimensions = array<i32: 0>} : vector<128x1xi32>
    %11 = vector.broadcast %9 : i32 to vector<128x1xi32>
    %12 = arith.addi %11, %10 : vector<128x1xi32>
    %13 = vector.broadcast %0 : i32 to vector<1x128xi32>
    %14 = arith.cmpi slt, %8, %13 : vector<1x128xi32>
    %15 = vector.broadcast %0 : i32 to vector<128x1xi32>
    %16 = arith.cmpi slt, %12, %15 : vector<128x1xi32>
    %17 = math.absf %4 : vector<1x128xf32>
    %18 = math.absf %6 : vector<128x1xf32>
    %cst = arith.constant 0.000000e+00 : f32
    %19 = vector.broadcast %cst : f32 to vector<128x1xf32>
    %20 = arith.cmpf ogt, %6, %19 : vector<128x1xf32>
    %21 = arith.andi %20, %16 : vector<128x1xi1>
    %cst_8 = arith.constant -3.000000e+38 : f32
    %22 = vector.broadcast %cst_8 : f32 to vector<1x128xf32>
    %23 = arith.select %14, %5, %22 : vector<1x128xi1>, vector<1x128xf32>
    %cst_9 = arith.constant dense<0xFF800000> : vector<1xf32>
    %24 = vector.multi_reduction <maximumf>, %23, %cst_9 [1] : vector<1x128xf32> to vector<1xf32>
    %25 = vector.shape_cast %24 : vector<1xf32> to vector<1x1xf32>
    %26 = vector.broadcast %25 : vector<1x1xf32> to vector<1x128xf32>
    %27 = arith.subf %5, %26 : vector<1x128xf32>
    %28 = math.exp %27 : vector<1x128xf32>
    %29 = vector.broadcast %17 : vector<1x128xf32> to vector<128x128xf32>
    %30 = vector.broadcast %18 : vector<128x1xf32> to vector<128x128xf32>
    %31 = arith.cmpf oge, %29, %30 : vector<128x128xf32>
    %32 = vector.broadcast %14 : vector<1x128xi1> to vector<128x128xi1>
    %33 = arith.andi %31, %32 : vector<128x128xi1>
    %cst_10 = arith.constant 0.000000e+00 : f32
    %34 = vector.shape_cast %28 : vector<1x128xf32> to vector<1x128xf32>
    %35 = vector.broadcast %34 : vector<1x128xf32> to vector<128x128xf32>
    %36 = vector.broadcast %cst_10 : f32 to vector<128x128xf32>
    %37 = arith.select %33, %35, %36 : vector<128x128xi1>, vector<128x128xf32>
    %cst_11 = arith.constant dense<0.000000e+00> : vector<128xf32>
    %38 = vector.multi_reduction <add>, %37, %cst_11 [1] : vector<128x128xf32> to vector<128xf32>
    %39 = vector.shape_cast %38 : vector<128xf32> to vector<128x1xf32>
    %40 = math.log %39 : vector<128x1xf32>
    %41 = vector.broadcast %25 : vector<1x1xf32> to vector<128x1xf32>
    %42 = arith.addf %40, %41 : vector<128x1xf32>
    %43 = arith.subf %7, %42 : vector<128x1xf32>
    %cst_12 = arith.constant 0.000000e+00 : f32
    %44 = vector.broadcast %cst_12 : f32 to vector<128x1xf32>
    %45 = arith.select %21, %43, %44 : vector<128x1xi1>, vector<128x1xf32>
    %c0_13 = arith.constant 0 : index
    %c0_14 = arith.constant 0 : index
    %46 = vector.load %arg5[%c0_13, %c0_14] : memref<1x1xf32, #tpu.memory_space<vmem>>, vector<1x1xf32>
    %cst_15 = arith.constant dense<0.000000e+00> : vector<1xf32>
    %47 = vector.multi_reduction <add>, %45, %cst_15 [0] : vector<128x1xf32> to vector<1xf32>
    %48 = vector.shape_cast %47 : vector<1xf32> to vector<1x1xf32>
    %49 = arith.addf %46, %48 : vector<1x1xf32>
    %c0_16 = arith.constant 0 : index
    %c0_17 = arith.constant 0 : index
    %50 = vector.load %arg5[%c0_16, %c0_17] : memref<1x1xf32, #tpu.memory_space<vmem>>, vector<1x1xf32>
    tpu.vector_store %arg5[%c0_16, %c0_17], %49 {strides = array<i32>} : memref<1x1xf32, #tpu.memory_space<vmem>>, vector<1x1xf32>,
    %c0_i32_18 = arith.constant 0 : i32
    %51 = arith.cmpi eq, %arg0, %c0_i32_18 : i32
    %52 = arith.extui %51 : i1 to i32
    %c0_i32_19 = arith.constant 0 : i32
    %53 = arith.cmpi ne, %52, %c0_i32_19 : i32
    scf.if %53 {
      %54 = arith.sitofp %0 : i32 to f32
      %cst_20 = arith.constant 1.000000e+00 : f32
      %55 = arith.divf %cst_20, %54 : f32
      %c0_21 = arith.constant 0 : index
      %c0_22 = arith.constant 0 : index
      %56 = vector.load %arg5[%c0_21, %c0_22] : memref<1x1xf32, #tpu.memory_space<vmem>>, vector<1x1xf32>
      %cst_23 = arith.constant 0.000000e+00 : f32
      %57 = vector.broadcast %cst_23 : f32 to vector<1x1xf32>
      %58 = arith.subf %57, %56 : vector<1x1xf32>
      %59 = vector.broadcast %55 : f32 to vector<1x1xf32>
      %60 = arith.mulf %58, %59 : vector<1x1xf32>
      %c0_24 = arith.constant 0 : index
      %c0_25 = arith.constant 0 : index
      %61 = vector.load %arg4[%c0_24, %c0_25] : memref<1x1xf32, #tpu.memory_space<vmem>>, vector<1x1xf32>
      tpu.vector_store %arg4[%c0_24, %c0_25], %60 {strides = array<i32>} : memref<1x1xf32, #tpu.memory_space<vmem>>, vector<1x1xf32>,
    } else {
    }
    return
  }
  func.func @transform_0(%arg0: i32, %arg1: memref<1xi32, #tpu.memory_space<smem>>) -> (i32, i32) {
    %c0_i32 = arith.constant 0 : i32
    %c0_i32_0 = arith.constant 0 : i32
    %c0_i32_1 = arith.constant 0 : i32
    return %c0_i32, %c0_i32_0 : i32, i32
  }
  func.func @transform_1(%arg0: i32, %arg1: memref<1xi32, #tpu.memory_space<smem>>) -> (i32, i32) {
    %c0_i32 = arith.constant 0 : i32
    %c0_i32_0 = arith.constant 0 : i32
    return %arg0, %c0_i32 : i32, i32
  }
  func.func @transform_2(%arg0: i32, %arg1: memref<1xi32, #tpu.memory_space<smem>>) -> (i32, i32) {
    %c0_i32 = arith.constant 0 : i32
    %c0_i32_0 = arith.constant 0 : i32
    %c0_i32_1 = arith.constant 0 : i32
    return %c0_i32, %c0_i32_0 : i32, i32
  }
}

</mosaic_0001>

<bundles_post_ra>
// kernel: tpu_custom_call.1
= control target key start
LH: loop header
LB: loop body
LE: loop exit
PB: predicated region body
PF: predicated region fallthrough
CT: control target
= control target key end

     0   :  { %v39_v2 = vlaneseq  ;;  %v605_v3 = vmov 0   ;;  %vm144_vm0 = vcmask 1040384   ;;  %s1021_s0 = inlined_call_operand.<no memory space> [shape: s32[1], index: 0, kind: input, shape index: {}]   ;;  %s1022_s1 = inlined_call_operand.vmem [shape: f32[2,128], index: 1, kind: input, shape index: {}]   ;;  %s1023_s2 = inlined_call_operand.vmem [shape: f32[128,2], index: 2, kind: input, shape index: {}]   ;;  %s1024_s3 = inlined_call_operand.hbm [shape: f32[1,1], index: 3, kind: output, shape index: {}]  }
   0x1   :  { %v632_v0 = vld [vmem:[%s1023_s2 + $0x8] sm:$0xff]  ;;  %v637_v1 = vld [vmem:[%s1023_s2 + $0x10] sm:$0xff]  ;;  %544 = vset.pattern.permute.xlu1 %v605_v3  ;;  %v643_v5 = vstv %s1021_s0  ;;  %543 = vset.pattern.permute.xlu0 %v605_v3  ;;  %v648_v6 = vld [vmem:[%s1022_s1 + $0x1] sm:$0x1] }
   0x2   :  { %v96_v4 = vand.u32 2147483647, %v632_v0  ;;  %v40_v7 = vand.u32 127, %v39_v2  ;;  %v97_v8 = vand.u32 2147483647, %v637_v1  ;;  %v660_v10 = vld [vmem:[%s1023_s2 + $0x18] sm:$0xff] }
   0x3   :  { %v98_v13 = vand.u32 2147483647, %v660_v10  ;;  %v669_v14 = vld [vmem:[%s1023_s2 + $0x20] sm:$0xff] }
   0x4   :  { %162 = vperm.xlu1 %544, %v96_v4   ;;  %vm653_vm1 = vcmp.lt.s32.totalorder %v40_v7, %v643_v5 }
   0x5   :  { %v143_v11 = vsel %vm653_vm1, %v648_v6, -3e+38 }
   0x6   :  { %v145_v12 = vsel %vm144_vm0, %v143_v11, -inf }
   0x7   :  { %146 = vmax.xlane.f32.xlu0 %v145_v12 }
   0x8   :  { %167 = vperm.xlu1 %544, %v97_v8  }
   0x9   :  { %9 = vsyncpa [#allocation6], 0  ;;  %v99_v15 = vand.u32 2147483647, %v669_v14  ;;  %v675_v16 = vld [vmem:[%s1023_s2 + $0x28] sm:$0xff]  ;;  %v681_v18 = vld [vmem:[%s1023_s2 + $0x30] sm:$0xff]  ;;  %s514_s23 = scvt.s32.f32 %s1021_s0 }
   0xa   :  { %v100_v17 = vand.u32 2147483647, %v675_v16  ;;  %v101_v19 = vand.u32 2147483647, %v681_v18  ;;  %v687_v20 = vld [vmem:[%s1023_s2 + $0x38] sm:$0xff]  ;;  %v692_v21 = vld [vmem:[%s1023_s2] sm:$0xff] }
   0xb   :  { %v102_v22 = vand.u32 2147483647, %v687_v20  ;;  %v698_v23 = vld [vmem:[%s1023_s2 + $0x40] sm:$0xff]  ;;  %v95_v24 = vand.u32 2147483647, %v692_v21  ;;  %v704_v25 = vld [vmem:[%s1023_s2 + $0x68] sm:$0xff] }
   0xc   :  { %172 = vperm.xlu1 %544, %v98_v13   ;;  %v103_v26 = vand.u32 2147483647, %v698_v23  ;;  %v710_v27 = vld [vmem:[%s1023_s2 + $0x48] sm:$0xff]  ;;  %v108_v28 = vand.u32 2147483647, %v704_v25  ;;  %v716_v29 = vld [vmem:[%s1023_s2 + $0x78] sm:$0xff] }
   0xd   :  { %v104_v30 = vand.u32 2147483647, %v710_v27  ;;  %v722_v31 = vld [vmem:[%s1023_s2 + $0x50] sm:$0xff]  ;;  %v110_v32 = vand.u32 2147483647, %v716_v29  ;;  %v729_v34 = vld [vmem:[%s1023_s2 + $0x58] sm:$0xff] }
   0xe   :  { %v105_v33 = vand.u32 2147483647, %v722_v31  ;;  %v106_v35 = vand.u32 2147483647, %v729_v34  ;;  %v735_v36 = vld [vmem:[%s1023_s2 + $0x60] sm:$0xff]  ;;  %v741_v38 = vld [vmem:[%s1023_s2 + $0x70] sm:$0xff] }
   0xf   :  { %v107_v37 = vand.u32 2147483647, %v735_v36  ;;  %v109_v39 = vand.u32 2147483647, %v741_v38  ;;  %v749_v47 = vshrl.u32 %v39_v2, 7  ;;  %s606_s0 = smov 127  }
  0x10   :  { %177 = vperm.xlu1 %544, %v99_v15   ;;  %v21_v49 = vld [vmem:[%s1022_s1] sm:$0x1]  ;;  %s608_s25 = smov [#allocation5]  }
  0x11   :  { %v755_v51 = vsub.s32 0, %v749_v47  ;;  %v94_v52 = vand.u32 2147483647, %v21_v49  ;;  %s529_s26 = sshll.u32 %s608_s25, 4  ;;  %s530_s26 = int_to_ptr.vmem [resolvable:$true] %s529_s26 }
  0x12   :  { %s581_s27 = scalar_lea.vmem %s530_s26, 16  ;;  %s585_s28 = scalar_lea.vmem %s530_s26, 32 }
  0x13   :  { %v758_v54 = vrot.slane %v94_v52, %v755_v51  ;;  %p582_p0 = scmp.ne.s32.totalorder %s530_s26, %s581_s27  ;;  %p586_p1 = scmp.lt.s32.totalorder %s530_s26, %s530_s26 }
  0x14   :  { %182 = vperm.xlu1 %544, %v100_v17   ;;  %p587_p2 = scmp.lt.s32.totalorder %s585_s28, %s581_s27 }
  0x16   :  { %p588_p3 = por %p587_p2, %p586_p1 }
  0x18   :  { %187 = vperm.xlu1 %544, %v101_v19   ;;  %p589_p4 = pnand %p588_p3, %p582_p0 }
  0x1c   :  { %192 = vperm.xlu1 %544, %v102_v22  }
  0x1d   :  { %157 = vperm.xlu0 %543, %v95_v24  }
  0x20   :  { %197 = vperm.xlu1 %544, %v103_v26  }
  0x21   :  { %222 = vperm.xlu0 %543, %v108_v28  }
  0x24   :  { %202 = vperm.xlu1 %544, %v104_v30  }
  0x25   :  { %232 = vperm.xlu0 %543, %v110_v32  }
  0x28   :  { %207 = vperm.xlu1 %544, %v105_v33  }
  0x2c   :  { %212 = vperm.xlu1 %544, %v106_v35  }
  0x30   :  { %217 = vperm.xlu1 %544, %v107_v37   ;;  %v515_v37 = vstv %s514_s23 }
  0x34   :  { %227 = vperm.xlu1 %544, %v109_v39  }
  0x83   :  { %v163_v40 = vpop.permute.xlu1 %162 }
  0x84   :  { %vm236_vm3 = vcmp.ge.f32.partialorder %v758_v54, %v163_v40 }
  0x85   :  { %vm254_vm6 = vmand %vm236_vm3, %vm653_vm1 }
  0x87   :  { %v168_v41 = vpop.permute.xlu1 %167 }
  0x88   :  { %vm237_vm5 = vcmp.ge.f32.partialorder %v758_v54, %v168_v41 }
  0x89   :  { %vm255_vm8 = vmand %vm237_vm5, %vm653_vm1 }
  0x8b   :  { %v173_v42 = vpop.permute.xlu1 %172 }
  0x8c   :  { %vm238_vm7 = vcmp.ge.f32.partialorder %v758_v54, %v173_v42 }
  0x8d   :  { %vm256_vm10 = vmand %vm238_vm7, %vm653_vm1 }
  0x8f   :  { %v178_v43 = vpop.permute.xlu1 %177 }
  0x90   :  { %vm239_vm9 = vcmp.ge.f32.partialorder %v758_v54, %v178_v43 }
  0x91   :  { %vm257_vm12 = vmand %vm239_vm9, %vm653_vm1 }
  0x93   :  { %v183_v44 = vpop.permute.xlu1 %182 }
  0x94   :  { %v744_v45 = vpop.xlane.xlu0 %146  ;;  %vm240_vm11 = vcmp.ge.f32.partialorder %v758_v54, %v183_v44 }
  0x95   :  { %v148_v46 = vsub.f32 %v648_v6, %v744_v45  ;;  %vm258_vm14 = vmand %vm240_vm11, %vm653_vm1  ;;  %v832_v44 = vrot.slane %v744_v45, %v755_v51 }
  0x97   :  { %v188_v48 = vpop.permute.xlu1 %187  ;;  %v149_v50 = vmul.f32 1.442695, %v148_v46 }
  0x98   :  { %vm241_vm13 = vcmp.ge.f32.partialorder %v758_v54, %v188_v48 }
  0x99   :  { %545 = vpow2.f32 %v149_v50 }
  0x9b   :  { %v193_v53 = vpop.permute.xlu1 %192 }
  0x9c   :  { %v158_v56 = vpop.permute.xlu0 %157  ;;  %vm242_vm15 = vcmp.ge.f32.partialorder %v758_v54, %v193_v53 }
  0x9d   :  { %vm235_vm2 = vcmp.ge.f32.partialorder %v758_v54, %v158_v56  ;;  %vm260_vm3 = vmand %vm242_vm15, %vm653_vm1 }
  0x9e   :  { %vm253_vm4 = vmand %vm235_vm2, %vm653_vm1 }
  0x9f   :  { %v198_v55 = vpop.permute.xlu1 %197  ;;  %vm259_vm2 = vmand %vm241_vm13, %vm653_vm1 }
  0xa0   :  { %v223_v7 = vpop.permute.xlu0 %222 }
  0xa3   :  { %v203_v57 = vpop.permute.xlu1 %202  ;;  %v546_v58 = vpop.eup %545 }
  0xa4   :  { %v765_v59 = vrot.slane %v546_v58, %v755_v51  ;;  %vm244_vm0 = vcmp.ge.f32.partialorder %v758_v54, %v203_v57  ;;  %v233_v17 = vpop.permute.xlu0 %232 }
  0xa6   :  { %v274_v60 = vsel %vm254_vm6, %v765_v59, 0.0  ;;  %v273_v61 = vsel %vm253_vm4, %v765_v59, 0.0  ;;  %v275_v63 = vsel %vm255_vm8, %v765_v59, 0.0  ;;  %v276_v2 = vsel %vm256_vm10, %v765_v59, 0.0  ;;  %vm262_vm6 = vmand %vm244_vm0, %vm653_vm1 }
  0xa7   :  { %v208_v62 = vpop.permute.xlu1 %207  ;;  %291 = vadd.xlane.f32.xlu0 %v274_v60  ;;  %289 = vadd.xlane.f32.xlu1 %v273_v61  ;;  %v277_v4 = vsel %vm257_vm12, %v765_v59, 0.0  ;;  %v278_v6 = vsel %vm258_vm14, %v765_v59, 0.0  ;;  %vm243_vm4 = vcmp.ge.f32.partialorder %v758_v54, %v198_v55  ;;  %v279_v8 = vsel %vm259_vm2, %v765_v59, 0.0 }
  0xa8   :  { %v280_v11 = vsel %vm260_vm3, %v765_v59, 0.0  ;;  %vm245_vm5 = vcmp.ge.f32.partialorder %v758_v54, %v208_v62  ;;  %vm261_vm8 = vmand %vm243_vm4, %vm653_vm1  ;;  %v282_v15 = vsel %vm262_vm6, %v765_v59, 0.0  ;;  %vm248_vm10 = vcmp.ge.f32.partialorder %v758_v54, %v223_v7 }
  0xa9   :  { %v281_v13 = vsel %vm261_vm8, %v765_v59, 0.0  ;;  %vm263_vm9 = vmand %vm245_vm5, %vm653_vm1  ;;  %vm250_vm14 = vcmp.ge.f32.partialorder %v758_v54, %v233_v17  ;;  %vm112_vm5 = vcmp.gt.f32.partialorder %v632_v0, 0.0  ;;  %vm78_vm6 = vcmp.lt.s32.totalorder %v749_v47, %v643_v5 }
  0xaa   :  { %v283_v22 = vsel %vm263_vm9, %v765_v59, 0.0  ;;  %vm266_vm13 = vmand %vm248_vm10, %vm653_vm1  ;;  %vm470_vm10 = vcmask 7168  }
  0xab   :  { %293 = vadd.xlane.f32.xlu0 %v275_v63  ;;  %295 = vadd.xlane.f32.xlu1 %v276_v2  ;;  %v213_v3 = vpop.permute.xlu1 %212  ;;  %v286_v28 = vsel %vm266_vm13, %v765_v59, 0.0  ;;  %vm268_vm2 = vmand %vm250_vm14, %vm653_vm1  ;;  %vm114_vm14 = vcmp.gt.f32.partialorder %v660_v10, 0.0 }
  0xac   :  { %vm246_vm7 = vcmp.ge.f32.partialorder %v758_v54, %v213_v3  ;;  %v288_v32 = vsel %vm268_vm2, %v765_v59, 0.0 }
  0xad   :  { %vm264_vm11 = vmand %vm246_vm7, %vm653_vm1  ;;  %vm111_vm7 = vcmp.gt.f32.partialorder %v692_v21, 0.0 }
  0xae   :  { %v284_v24 = vsel %vm264_vm11, %v765_v59, 0.0  ;;  %vm127_vm9 = vmand %vm111_vm7, %vm78_vm6 }
  0xaf   :  { %297 = vadd.xlane.f32.xlu0 %v277_v4  ;;  %299 = vadd.xlane.f32.xlu1 %v278_v6  ;;  %v218_v12 = vpop.permute.xlu1 %217 }
  0xb0   :  { %vm247_vm12 = vcmp.ge.f32.partialorder %v758_v54, %v218_v12 }
  0xb1   :  { %vm265_vm15 = vmand %vm247_vm12, %vm653_vm1  ;;  %vm113_vm12 = vcmp.gt.f32.partialorder %v637_v1, 0.0 }
  0xb2   :  { %v285_v26 = vsel %vm265_vm15, %v765_v59, 0.0 }
  0xb3   :  { %301 = vadd.xlane.f32.xlu0 %v279_v8  ;;  %303 = vadd.xlane.f32.xlu1 %v280_v11  ;;  %v228_v19 = vpop.permute.xlu1 %227 }
  0xb4   :  { %vm249_vm0 = vcmp.ge.f32.partialorder %v758_v54, %v228_v19 }
  0xb5   :  { %vm267_vm3 = vmand %vm249_vm0, %vm653_vm1  ;;  %vm19_vm1 = vcmask 0  }
  0xb6   :  { %v287_v30 = vsel %vm267_vm3, %v765_v59, 0.0  ;;  %vm115_vm3 = vcmp.gt.f32.partialorder %v669_v14, 0.0 }
  0xb7   :  { %305 = vadd.xlane.f32.xlu0 %v281_v13  ;;  %307 = vadd.xlane.f32.xlu1 %v282_v15 }
  0xbb   :  { %309 = vadd.xlane.f32.xlu0 %v283_v22  ;;  %311 = vadd.xlane.f32.xlu1 %v284_v24 }
  0xbf   :  { %313 = vadd.xlane.f32.xlu0 %v285_v26  ;;  %315 = vadd.xlane.f32.xlu1 %v286_v28 }
  0xc3   :  { %317 = vadd.xlane.f32.xlu0 %v287_v30  ;;  %319 = vadd.xlane.f32.xlu1 %v288_v32 }
 0x134   :  { %v292_v33 = vpop.xlane.xlu0 %291  ;;  %v290_v35 = vpop.xlane.xlu1 %289 }
 0x135   :  { %547 = vlog2.f32 %v292_v33 }
 0x136   :  { %549 = vlog2.f32 %v290_v35 }
 0x137   :  { %551 = vrcp.f32 %v515_v37 }
 0x138   :  { %v294_v39 = vpop.xlane.xlu0 %293  ;;  %v296_v40 = vpop.xlane.xlu1 %295 }
 0x139   :  { %553 = vlog2.f32 %v294_v39 }
 0x13a   :  { %555 = vlog2.f32 %v296_v40 }
 0x13c   :  { %v298_v9 = vpop.xlane.xlu0 %297  ;;  %v300_v41 = vpop.xlane.xlu1 %299 }
 0x13d   :  { %557 = vlog2.f32 %v298_v9 }
 0x13e   :  { %559 = vlog2.f32 %v300_v41 }
 0x13f   :  { %v548_v42 = vpop.eup %547 }
 0x140   :  { %v550_v43 = vpop.eup %549  ;;  %v324_v46 = vmul.f32 0.6931472, %v548_v42  ;;  %v302_v48 = vpop.xlane.xlu0 %301 }
 0x141   :  { %v304_v49 = vpop.xlane.xlu1 %303  ;;  %v552_v50 = vpop.eup %551  ;;  %v322_v52 = vmul.f32 0.6931472, %v550_v43  ;;  %561 = vlog2.f32 %v302_v48 }
 0x142   :  { %v358_v53 = vadd.f32 %v832_v44, %v324_v46  ;;  %563 = vlog2.f32 %v304_v49  ;;  %537 = vpush %v552_v50 }
 0x143   :  { %v554_v54 = vpop.eup %553  ;;  %v357_v55 = vadd.f32 %v832_v44, %v322_v52 }
 0x144   :  { %v556_v56 = vpop.eup %555  ;;  %v326_v57 = vmul.f32 0.6931472, %v554_v54  ;;  %v306_v58 = vpop.xlane.xlu0 %305  ;;  %v374_v45 = vsub.f32 %v632_v0, %v358_v53  ;;  %v48_v0 = vadd.s32 40, %v749_v47 }
 0x145   :  { %v308_v59 = vpop.xlane.xlu1 %307  ;;  %v328_v51 = vmul.f32 0.6931472, %v556_v56  ;;  %565 = vlog2.f32 %v306_v58  ;;  %v373_v60 = vsub.f32 %v692_v21, %v357_v55 }
 0x146   :  { %v359_v61 = vadd.f32 %v832_v44, %v326_v57  ;;  %567 = vlog2.f32 %v308_v59  ;;  %407 = vrot.lane.b32.xlu1 %v374_v45, %s606_s0 }
 0x147   :  { %v558_v62 = vpop.eup %557  ;;  %v360_v63 = vadd.f32 %v832_v44, %v328_v51  ;;  %405 = vrot.lane.b32.xlu0 %v373_v60, %s606_s0 }
 0x148   :  { %v560_v2 = vpop.eup %559  ;;  %v330_v3 = vmul.f32 0.6931472, %v558_v62  ;;  %v310_v4 = vpop.xlane.xlu0 %309  ;;  %v375_v7 = vsub.f32 %v637_v1, %v359_v61  ;;  %v49_v1 = vadd.s32 48, %v749_v47 }
 0x149   :  { %v312_v6 = vpop.xlane.xlu1 %311  ;;  %v332_v8 = vmul.f32 0.6931472, %v560_v2  ;;  %569 = vlog2.f32 %v310_v4  ;;  %v376_v11 = vsub.f32 %v660_v10, %v360_v63 }
 0x14a   :  { %v361_v12 = vadd.f32 %v832_v44, %v330_v3  ;;  %571 = vlog2.f32 %v312_v6  ;;  %409 = vrot.lane.b32.xlu1 %v375_v7, %s606_s0 }
 0x14b   :  { %v562_v13 = vpop.eup %561  ;;  %v362_v15 = vadd.f32 %v832_v44, %v332_v8  ;;  %411 = vrot.lane.b32.xlu0 %v376_v11, %s606_s0 }
 0x14c   :  { %v564_v17 = vpop.eup %563  ;;  %v334_v19 = vmul.f32 0.6931472, %v562_v13  ;;  %v314_v22 = vpop.xlane.xlu0 %313  ;;  %v377_v26 = vsub.f32 %v669_v14, %v361_v12 }
 0x14d   :  { %v316_v24 = vpop.xlane.xlu1 %315  ;;  %v336_v28 = vmul.f32 0.6931472, %v564_v17  ;;  %573 = vlog2.f32 %v314_v22  ;;  %v378_v30 = vsub.f32 %v675_v16, %v362_v15  ;;  %v607_v17 = vmov 0.0  }
 0x14e   :  { %v363_v32 = vadd.f32 %v832_v44, %v334_v19  ;;  %575 = vlog2.f32 %v316_v24  ;;  %413 = vrot.lane.b32.xlu1 %v377_v26, %s606_s0  ;;  %20 = vst.msk [vmem:[#allocation2] sm:$0x1] %vm19_vm1, %v607_v17  ;;  %v44_v19 = vadd.s32 8, %v749_v47  ;;  %v46_v22 = vadd.s32 24, %v749_v47 }
 0x14f   :  { %v566_v33 = vpop.eup %565  ;;  %v364_v35 = vadd.f32 %v832_v44, %v336_v28  ;;  %415 = vrot.lane.b32.xlu0 %v378_v30, %s606_s0  ;;  %v47_v24 = vadd.s32 32, %v749_v47 }
 0x150   :  { %v568_v37 = vpop.eup %567  ;;  %v338_v39 = vmul.f32 0.6931472, %v566_v33  ;;  %v318_v40 = vpop.xlane.xlu0 %317  ;;  %v379_v41 = vsub.f32 %v681_v18, %v363_v32  ;;  %vm79_vm4 = vcmp.lt.s32.totalorder %v44_v19, %v643_v5  ;;  %vm81_vm13 = vcmp.lt.s32.totalorder %v46_v22, %v643_v5 }
 0x151   :  { %v320_v9 = vpop.xlane.xlu1 %319  ;;  %v340_v42 = vmul.f32 0.6931472, %v568_v37  ;;  %577 = vlog2.f32 %v318_v40  ;;  %v380_v43 = vsub.f32 %v687_v20, %v364_v35  ;;  %vm128_vm8 = vmand %vm112_vm5, %vm79_vm4  ;;  %vm82_vm2 = vcmp.lt.s32.totalorder %v47_v24, %v643_v5 }
 0x152   :  { %v365_v46 = vadd.f32 %v832_v44, %v338_v39  ;;  %579 = vlog2.f32 %v320_v9  ;;  %417 = vrot.lane.b32.xlu1 %v379_v41, %s606_s0  ;;  %vm899_vm0 = vmand %vm114_vm14, %vm81_vm13  ;;  %vm83_vm4 = vcmp.lt.s32.totalorder %v48_v0, %v643_v5  ;;  %vm116_vm5 = vcmp.gt.f32.partialorder %v675_v16, 0.0 }
 0x153   :  { %v570_v48 = vpop.eup %569  ;;  %v366_v49 = vadd.f32 %v832_v44, %v340_v42  ;;  %419 = vrot.lane.b32.xlu0 %v380_v43, %s606_s0  ;;  %v50_v37 = vadd.s32 56, %v749_v47  ;;  %vm912_vm6 = vmand %vm115_vm3, %vm82_vm2  ;;  %v51_v16 = vadd.s32 64, %v749_v47  ;;  %vm120_vm3 = vcmp.gt.f32.partialorder %v710_v27, 0.0 }
 0x154   :  { %v572_v50 = vpop.eup %571  ;;  %v342_v52 = vmul.f32 0.6931472, %v570_v48  ;;  %v381_v53 = vsub.f32 %v698_v23, %v365_v46  ;;  %vm916_vm7 = vmand %vm116_vm5, %vm83_vm4 }
 0x155   :  { %v344_v54 = vmul.f32 0.6931472, %v572_v50  ;;  %v382_v55 = vsub.f32 %v710_v27, %v366_v49  ;;  %v52_v50 = vadd.s32 72, %v749_v47  ;;  %v55_v27 = vadd.s32 96, %v749_v47 }
 0x156   :  { %v367_v56 = vadd.f32 %v832_v44, %v342_v52  ;;  %421 = vrot.lane.b32.xlu1 %v381_v53, %s606_s0 }
 0x157   :  { %v574_v57 = vpop.eup %573  ;;  %v368_v58 = vadd.f32 %v832_v44, %v344_v54  ;;  %423 = vrot.lane.b32.xlu0 %v382_v55, %s606_s0  ;;  %vm87_vm2 = vcmp.lt.s32.totalorder %v52_v50, %v643_v5 }
 0x158   :  { %v576_v59 = vpop.eup %575  ;;  %v346_v45 = vmul.f32 0.6931472, %v574_v57  ;;  %v383_v51 = vsub.f32 %v722_v31, %v367_v56  ;;  %vm956_vm5 = vmand %vm120_vm3, %vm87_vm2 }
 0x159   :  { %v348_v60 = vmul.f32 0.6931472, %v576_v59  ;;  %v384_v61 = vsub.f32 %v729_v34, %v368_v58 }
 0x15a   :  { %v369_v62 = vadd.f32 %v832_v44, %v346_v45  ;;  %425 = vrot.lane.b32.xlu1 %v383_v51, %s606_s0  ;;  %v54_v51 = vadd.s32 88, %v749_v47 }
 0x15b   :  { %v578_v63 = vpop.eup %577  ;;  %v370_v2 = vadd.f32 %v832_v44, %v348_v60  ;;  %427 = vrot.lane.b32.xlu0 %v384_v61, %s606_s0 }
 0x15c   :  { %v580_v3 = vpop.eup %579  ;;  %v350_v4 = vmul.f32 0.6931472, %v578_v63  ;;  %v385_v6 = vsub.f32 %v735_v36, %v369_v62 }
 0x15d   :  { %v352_v7 = vmul.f32 0.6931472, %v580_v3  ;;  %v386_v8 = vsub.f32 %v704_v25, %v370_v2 }
 0x15e   :  { %v371_v11 = vadd.f32 %v832_v44, %v350_v4  ;;  %429 = vrot.lane.b32.xlu1 %v385_v6, %s606_s0 }
 0x15f   :  { %v372_v12 = vadd.f32 %v832_v44, %v352_v7  ;;  %431 = vrot.lane.b32.xlu0 %v386_v8, %s606_s0  ;;  %v45_v44 = vadd.s32 16, %v749_v47  ;;  %v56_v8 = vadd.s32 104, %v749_v47 }
 0x160   :  { %v387_v13 = vsub.f32 %v741_v38, %v371_v11 }
 0x161   :  { %v388_v15 = vsub.f32 %v716_v29, %v372_v12  ;;  %vm80_vm11 = vcmp.lt.s32.totalorder %v45_v44, %v643_v5 }
 0x162   :  { %433 = vrot.lane.b32.xlu1 %v387_v13, %s606_s0  ;;  %vm129_vm15 = vmand %vm113_vm12, %vm80_vm11  ;;  %vm85_vm11 = vcmp.lt.s32.totalorder %v50_v37, %v643_v5  ;;  %vm118_vm12 = vcmp.gt.f32.partialorder %v687_v20, 0.0  ;;  %v53_v20 = vadd.s32 80, %v749_v47 }
 0x163   :  { %435 = vrot.lane.b32.xlu0 %v388_v15, %s606_s0  ;;  %vm936_vm14 = vmand %vm118_vm12, %vm85_vm11 }
 0x173   :  { %s538_s24 = spop %537 }
 0x1b8   :  { %v408_v26 = vpop.permute.xlu1 %407 }
 0x1b9   :  { %v406_v28 = vpop.permute.xlu0 %405  ;;  %v454_v21 = vsel %vm128_vm8, %v408_v26, 0.0  ;;  %vm84_vm8 = vcmp.lt.s32.totalorder %v49_v1, %v643_v5  ;;  %v58_v26 = vadd.s32 120, %v749_v47 }
 0x1ba   :  { %v453_v30 = vsel %vm127_vm9, %v406_v28, 0.0  ;;  %v472_v32 = vsel %vm470_vm10, %v454_v21, 0.0  ;;  %vm117_vm9 = vcmp.gt.f32.partialorder %v681_v18, 0.0 }
 0x1bb   :  { %v471_v33 = vsel %vm470_vm10, %v453_v30, 0.0  ;;  %vm932_vm13 = vmand %vm117_vm9, %vm84_vm8  ;;  %vm89_vm8 = vcmp.lt.s32.totalorder %v54_v51, %v643_v5  ;;  %vm122_vm9 = vcmp.gt.f32.partialorder %v729_v34, 0.0  ;;  %v57_v34 = vadd.s32 112, %v749_v47 }
 0x1bc   :  { %v410_v10 = vpop.permute.xlu1 %409  ;;  %v473_v39 = vadd.f32 %v472_v32, %v471_v33  ;;  %vm976_vm12 = vmand %vm122_vm9, %vm89_vm8 }
 0x1bd   :  { %v412_v40 = vpop.permute.xlu0 %411  ;;  %v455_v9 = vsel %vm129_vm15, %v410_v10, 0.0  ;;  %vm86_vm15 = vcmp.lt.s32.totalorder %v51_v16, %v643_v5 }
 0x1be   :  { %v456_v41 = vsel %vm899_vm0, %v412_v40, 0.0  ;;  %v474_v42 = vsel %vm470_vm10, %v455_v9, 0.0  ;;  %vm119_vm0 = vcmp.gt.f32.partialorder %v698_v23, 0.0 }
 0x1bf   :  { %v475_v14 = vadd.f32 %v474_v42, %v473_v39  ;;  %v476_v48 = vsel %vm470_vm10, %v456_v41, 0.0  ;;  %vm952_vm4 = vmand %vm119_vm0, %vm86_vm15  ;;  %vm91_vm15 = vcmp.lt.s32.totalorder %v56_v8, %v643_v5  ;;  %vm124_vm0 = vcmp.gt.f32.partialorder %v704_v25, 0.0 }
 0x1c0   :  { %v414_v49 = vpop.permute.xlu1 %413  ;;  %vm992_vm3 = vmand %vm124_vm0, %vm91_vm15 }
 0x1c1   :  { %v416_v52 = vpop.permute.xlu0 %415  ;;  %v477_v53 = vadd.f32 %v476_v48, %v475_v14  ;;  %v457_v54 = vsel %vm912_vm6, %v414_v49, 0.0  ;;  %vm88_vm6 = vcmp.lt.s32.totalorder %v53_v20, %v643_v5 }
 0x1c2   :  { %v458_v55 = vsel %vm916_vm7, %v416_v52, 0.0  ;;  %v478_v18 = vsel %vm470_vm10, %v457_v54, 0.0  ;;  %vm121_vm7 = vcmp.gt.f32.partialorder %v722_v31, 0.0  ;;  %v469_v54 = vld [vmem:[#allocation2] sm:$0x1] }
 0x1c3   :  { %v479_v57 = vadd.f32 %v478_v18, %v477_v53  ;;  %v480_v59 = vsel %vm470_vm10, %v458_v55, 0.0  ;;  %vm972_vm11 = vmand %vm121_vm7, %vm88_vm6  ;;  %vm93_vm6 = vcmp.lt.s32.totalorder %v58_v26, %v643_v5  ;;  %vm126_vm7 = vcmp.gt.f32.partialorder %v716_v29, 0.0 }
 0x1c4   :  { %v418_v45 = vpop.permute.xlu1 %417  ;;  %vm142_vm9 = vmand %vm126_vm7, %vm93_vm6 }
 0x1c5   :  { %v420_v60 = vpop.permute.xlu0 %419  ;;  %v481_v61 = vadd.f32 %v480_v59, %v479_v57  ;;  %v459_v62 = vsel %vm932_vm13, %v418_v45, 0.0  ;;  %vm90_vm13 = vcmp.lt.s32.totalorder %v55_v27, %v643_v5  ;;  %v520_v57 = vstv %s538_s24 }
 0x1c6   :  { %v460_v63 = vsel %vm936_vm14, %v420_v60, 0.0  ;;  %v482_v23 = vsel %vm470_vm10, %v459_v62, 0.0  ;;  %vm123_vm14 = vcmp.gt.f32.partialorder %v735_v36, 0.0 }
 0x1c7   :  { %v483_v3 = vadd.f32 %v482_v23, %v481_v61  ;;  %v484_v6 = vsel %vm470_vm10, %v460_v63, 0.0  ;;  %vm139_vm2 = vmand %vm123_vm14, %vm90_vm13 }
 0x1c8   :  { %v422_v7 = vpop.permute.xlu1 %421 }
 0x1c9   :  { %v424_v11 = vpop.permute.xlu0 %423  ;;  %v485_v12 = vadd.f32 %v484_v6, %v483_v3  ;;  %v461_v13 = vsel %vm952_vm4, %v422_v7, 0.0  ;;  %vm92_vm4 = vcmp.lt.s32.totalorder %v57_v34, %v643_v5 }
 0x1ca   :  { %v462_v15 = vsel %vm956_vm5, %v424_v11, 0.0  ;;  %v486_v31 = vsel %vm470_vm10, %v461_v13, 0.0  ;;  %vm125_vm5 = vcmp.gt.f32.partialorder %v741_v38, 0.0 }
 0x1cb   :  { %v487_v19 = vadd.f32 %v486_v31, %v485_v12  ;;  %v488_v22 = vsel %vm470_vm10, %v462_v15, 0.0  ;;  %vm141_vm8 = vmand %vm125_vm5, %vm92_vm4 }
 0x1cc   :  { %v426_v24 = vpop.permute.xlu1 %425 }
 0x1cd   :  { %v428_v0 = vpop.permute.xlu0 %427  ;;  %v489_v28 = vadd.f32 %v488_v22, %v487_v19  ;;  %v463_v21 = vsel %vm972_vm11, %v426_v24, 0.0 }
 0x1ce   :  { %v464_v30 = vsel %vm976_vm12, %v428_v0, 0.0  ;;  %v490_v36 = vsel %vm470_vm10, %v463_v21, 0.0 }
 0x1cf   :  { %v491_v32 = vadd.f32 %v490_v36, %v489_v28  ;;  %v492_v25 = vsel %vm470_vm10, %v464_v30, 0.0 }
 0x1d0   :  { %v430_v47 = vpop.permute.xlu1 %429 }
 0x1d1   :  { %v432_v35 = vpop.permute.xlu0 %431  ;;  %v493_v1 = vadd.f32 %v492_v25, %v491_v32  ;;  %v465_v10 = vsel %vm139_vm2, %v430_v47, 0.0 }
 0x1d2   :  { %v466_v37 = vsel %vm992_vm3, %v432_v35, 0.0  ;;  %v494_v39 = vsel %vm470_vm10, %v465_v10, 0.0 }
 0x1d3   :  { %v495_v40 = vadd.f32 %v494_v39, %v493_v1  ;;  %v496_v38 = vsel %vm470_vm10, %v466_v37, 0.0 }
 0x1d4   :  { %v434_v9 = vpop.permute.xlu1 %433 }
 0x1d5   :  { %v436_v41 = vpop.permute.xlu0 %435  ;;  %v497_v42 = vadd.f32 %v496_v38, %v495_v40  ;;  %v467_v43 = vsel %vm141_vm8, %v434_v9, 0.0 }
 0x1d6   :  { %v468_v5 = vsel %vm142_vm9, %v436_v41, 0.0  ;;  %v498_v29 = vsel %vm470_vm10, %v467_v43, 0.0 }
 0x1d7   :  { %v499_v14 = vadd.f32 %v498_v29, %v497_v42  ;;  %v500_v46 = vsel %vm470_vm10, %v468_v5, 0.0 }
 0x1d9   :  { %v501_v16 = vadd.f32 %v500_v46, %v499_v14 }
 0x1db   :  { %v502_v48 = vrot.slane %v501_v16, 4 }
 0x1dd   :  { %v503_v49 = vadd.f32 %v502_v48, %v501_v16 }
 0x1df   :  { %v504_v50 = vrot.slane %v503_v49, 2 }
 0x1e1   :  { %v505_v52 = vadd.f32 %v504_v50, %v503_v49 }
 0x1e3   :  { %v506_v53 = vrot.slane %v505_v52, 1 }
 0x1e5   :  { %v507_v55 = vadd.f32 %v506_v53, %v505_v52 }
 0x1e7   :  { %v508_v18 = vadd.f32 %v507_v55, %v469_v54 }
 0x1e9   :  { %510 = vst.msk [vmem:[#allocation2] sm:$0x1] %vm19_vm1, %v508_v18 }
 0x1f0   :  { %v518_v56 = vld [vmem:[#allocation2] sm:$0x1] }
 0x1f1   :  { %v519_v58 = vsub.f32 0.0, %v518_v56 }
 0x1f3   :  { %v521_v20 = vmul.f32 %v520_v57, %v519_v58 }
 0x1f5   :  { %522 = vst.msk [vmem:[#allocation5] sm:$0x1] %vm19_vm1, %v521_v20 }
 0x1f6   :  { %592 = shalt.err (!%p589_p4)
}
 0x1f7   :  { %s593_s4 = scalar_lea.hbm %s1024_s3, 16 }
 0x1f8   :  { %p594_p5 = scmp.ne.s32.totalorder %s1024_s3, %s593_s4  ;;  %p597_p6 = scmp.lt.u32.totalorder %s593_s4, %s1024_s3 }
 0x1fa   :  { %p599_p7 = pnand %p597_p6, %p594_p5 }
 0x1fc   :  { %602 = shalt.err (!%p599_p7)
}
 0x1fd   :  { %532 = dma.vmem_to_hbm [thread:$0]  %s530_s26, 16, %s1024_s3, [#allocation6]  }
 0x1fe   :  { %603 = dma.done.wait [#allocation6], 16  }
 0x1ff   :  { %604 = vsyncadd [#allocation6], 4294967280 }
 0x200   :  { %536 = vsyncpa [#allocation6], 1 }

</bundles_post_ra>
